<compile_context>
chip_gen: v7x
topology: tpu7x:2x2x1
jax: 0.10.0
libtpu: 0.0.40
codegen_flags: <defaults>
</compile_context>

<pallas_src>
import jax
import jax.numpy as jnp
from jax.experimental import pallas as pl
from jax.experimental.pallas import tpu as pltpu

_LANE = 128
_NEG_INF = -1e30


def _softmax_policy_kernel(phi_ref, w_ref, b_ref, pi_ref, logpi_ref):
    # Linear layer on the MXU, accumulate in f32. Padded weight columns are 0,
    # padded bias entries are -1e30, so padded logits never affect the softmax.
    logits = (
        jnp.dot(phi_ref[...], w_ref[...], preferred_element_type=jnp.float32)
        + b_ref[...]
    )  # [TB, A_pad]

    # Numerically-stable log_softmax over the action (lane) axis.
    m = jnp.max(logits, axis=-1, keepdims=True)          # [TB, 1]
    shifted = logits - m                                  # [TB, A_pad]
    denom = jnp.sum(jnp.exp(shifted), axis=-1, keepdims=True)
    log_pi = shifted - jnp.log(denom)                     # [TB, A_pad]

    logpi_ref[...] = log_pi.astype(logpi_ref.dtype)
    # softmax = exp(log_softmax): pushes the "divide" onto the EUP slot.
    pi_ref[...] = jnp.exp(log_pi).astype(pi_ref.dtype)


def _round_up(x: int, m: int) -> int:
    return ((x + m - 1) // m) * m


def softmax_policy_forward(phi, weight, bias, *, block_b: int = 512):
    """phi: [B, F] f32; weight: [F, A] f32 (pre-transposed vs torch); bias: [A] f32.

    Returns (pi, log_pi), each [B, A] f32.
    """
    B, Fdim = phi.shape
    A = weight.shape[1]

    # --- lane-dense padding of the action axis --------------------------------
    A_pad = _round_up(max(A, 1), _LANE)
    w_p = jnp.zeros((Fdim, A_pad), dtype=jnp.float32).at[:, :A].set(
        weight.astype(jnp.float32)
    )
    b_p = jnp.full((1, A_pad), _NEG_INF, dtype=jnp.float32).at[0, :A].set(
        bias.astype(jnp.float32)
    )

    # --- batch tiling ----------------------------------------------------------
    TB = min(block_b, _round_up(B, 8))
    B_pad = _round_up(B, TB)
    phi_p = phi.astype(jnp.float32)
    if B_pad != B:
        phi_p = jnp.pad(phi_p, ((0, B_pad - B), (0, 0)))
    n_tiles = B_pad // TB

    cost = pl.CostEstimate(
        flops=2 * B_pad * Fdim * A_pad,
        transcendentals=2 * B_pad * A_pad,
        bytes_accessed=4 * (B_pad * Fdim + Fdim * A_pad + A_pad + 2 * B_pad * A_pad),
    )

    pi_p, log_pi_p = pl.pallas_call(
        _softmax_policy_kernel,
        out_shape=(
            jax.ShapeDtypeStruct((B_pad, A_pad), jnp.float32),
            jax.ShapeDtypeStruct((B_pad, A_pad), jnp.float32),
        ),
        grid=(n_tiles,),
        in_specs=[
            pl.BlockSpec((TB, Fdim), lambda i: (i, 0)),      # phi tile, streamed
            pl.BlockSpec((Fdim, A_pad), lambda i: (0, 0)),   # weight, resident
            pl.BlockSpec((1, A_pad), lambda i: (0, 0)),      # bias, resident
        ],
        out_specs=(
            pl.BlockSpec((TB, A_pad), lambda i: (i, 0)),
            pl.BlockSpec((TB, A_pad), lambda i: (i, 0)),
        ),
        compiler_params=pltpu.CompilerParams(
            dimension_semantics=("parallel",),
            vmem_limit_bytes=32 * 1024 * 1024,
        ),
        cost_estimate=cost,
    )(phi_p, w_p, b_p)

    return pi_p[:B, :A], log_pi_p[:B, :A]


def _reference(phi, weight, bias):
    logits = phi @ weight + bias
    return jax.nn.softmax(logits, axis=-1), jax.nn.log_softmax(logits, axis=-1)


if __name__ == "__main__":
    # Small shapes consistent with the module: n_features=32, n_actions=4.
    N_FEATURES, N_ACTIONS = 32, 4

    key = jax.random.PRNGKey(0)
    k_phi, k_w, k_phi2 = jax.random.split(key, 3)

    # Deterministic synthetic parameters (layer_init-style: scaled weights, zero bias).
    weight = 0.1 * jax.random.normal(k_w, (N_FEATURES, N_ACTIONS), dtype=jnp.float32)
    bias = jnp.zeros((N_ACTIONS,), dtype=jnp.float32)

    # Case 1: tiny batch (single grid step).
    B1 = 8
    phi1 = jax.random.normal(k_phi, (B1, N_FEATURES), dtype=jnp.float32)
    pi1, log_pi1 = softmax_policy_forward(phi1, weight, bias)
    jax.block_until_ready((pi1, log_pi1))
    pi1_ref, logpi1_ref = _reference(phi1, weight, bias)
    assert jnp.allclose(pi1, pi1_ref, atol=1e-5), "softmax mismatch (B=8)"
    assert jnp.allclose(log_pi1, logpi1_ref, atol=1e-5), "log_softmax mismatch (B=8)"
    assert jnp.allclose(jnp.sum(pi1, axis=-1), 1.0, atol=1e-5)

    # Case 2: multi-tile grid with batch padding (exercises the pipeline path).
    B2 = 300
    phi2 = jax.random.normal(k_phi2, (B2, N_FEATURES), dtype=jnp.float32)
    pi2, log_pi2 = softmax_policy_forward(phi2, weight, bias, block_b=128)
    jax.block_until_ready((pi2, log_pi2))
    pi2_ref, logpi2_ref = _reference(phi2, weight, bias)
    assert jnp.allclose(pi2, pi2_ref, atol=1e-5), "softmax mismatch (B=300)"
    assert jnp.allclose(log_pi2, logpi2_ref, atol=1e-5), "log_softmax mismatch (B=300)"
    assert jnp.allclose(jnp.sum(pi2, axis=-1), 1.0, atol=1e-5)

    print("KERNEL_OK")
</pallas_src>

<mosaic_0001>
module attributes {stable_mosaic.version = 11 : i64} {
  func.func @_softmax_policy_kernel(%arg0: i32, %arg1: memref<8x32xf32, #tpu.memory_space<vmem>>, %arg2: memref<32x128xf32, #tpu.memory_space<vmem>>, %arg3: memref<1x128xf32, #tpu.memory_space<vmem>>, %arg4: memref<8x128xf32, #tpu.memory_space<vmem>>, %arg5: memref<8x128xf32, #tpu.memory_space<vmem>>) attributes {dimension_semantics = [#tpu.dimension_semantics<parallel>], iteration_bounds = array<i64: 1>, scalar_prefetch = 0 : i64, scratch_operands = 0 : i64, tpu.core_type = #tpu.core_type<tc>, window_params = [{transform_indices = @transform_0, window_bounds = array<i64: 8, 32>}, {pipeline_mode = #tpu.pipeline_mode<synchronous>, transform_indices = @transform_1, window_bounds = array<i64: 32, 128>}, {pipeline_mode = #tpu.pipeline_mode<synchronous>, transform_indices = @transform_2, window_bounds = array<i64: 1, 128>}, {transform_indices = @transform_3, window_bounds = array<i64: 8, 128>}, {transform_indices = @transform_4, window_bounds = array<i64: 8, 128>}]} {
    %c0 = arith.constant 0 : index
    %c0_0 = arith.constant 0 : index
    %0 = vector.load %arg1[%c0, %c0_0] : memref<8x32xf32, #tpu.memory_space<vmem>>, vector<8x32xf32>
    %c0_1 = arith.constant 0 : index
    %c0_2 = arith.constant 0 : index
    %1 = vector.load %arg2[%c0_1, %c0_2] : memref<32x128xf32, #tpu.memory_space<vmem>>, vector<32x128xf32>
    %cst = arith.constant dense<0.000000e+00> : vector<8x128xf32>
    %2 = tpu.matmul %0, %1, %cst {dimension_numbers = #tpu.dot_dimension_numbers<[1], [0], [0], [1], [0, 0, 1, 1], [], []>} : vector<8x32xf32>, vector<32x128xf32>, vector<8x128xf32> -> vector<8x128xf32>
    %c0_3 = arith.constant 0 : index
    %c0_4 = arith.constant 0 : index
    %3 = vector.load %arg3[%c0_3, %c0_4] : memref<1x128xf32, #tpu.memory_space<vmem>>, vector<1x128xf32>
    %4 = vector.broadcast %3 : vector<1x128xf32> to vector<8x128xf32>
    %5 = arith.addf %2, %4 : vector<8x128xf32>
    %cst_5 = arith.constant dense<0xFF800000> : vector<8xf32>
    %6 = vector.multi_reduction <maximumf>, %5, %cst_5 [1] : vector<8x128xf32> to vector<8xf32>
    %7 = vector.shape_cast %6 : vector<8xf32> to vector<8x1xf32>
    %8 = vector.broadcast %7 : vector<8x1xf32> to vector<8x128xf32>
    %9 = arith.subf %5, %8 : vector<8x128xf32>
    %10 = math.exp %9 : vector<8x128xf32>
    %cst_6 = arith.constant dense<0.000000e+00> : vector<8xf32>
    %11 = vector.multi_reduction <add>, %10, %cst_6 [1] : vector<8x128xf32> to vector<8xf32>
    %12 = vector.shape_cast %11 : vector<8xf32> to vector<8x1xf32>
    %13 = math.log %12 : vector<8x1xf32>
    %14 = vector.broadcast %13 : vector<8x1xf32> to vector<8x128xf32>
    %15 = arith.subf %9, %14 : vector<8x128xf32>
    %c0_7 = arith.constant 0 : index
    %c0_8 = arith.constant 0 : index
    %16 = vector.load %arg5[%c0_7, %c0_8] : memref<8x128xf32, #tpu.memory_space<vmem>>, vector<8x128xf32>
    tpu.vector_store %arg5[%c0_7, %c0_8], %15 {strides = array<i32>} : memref<8x128xf32, #tpu.memory_space<vmem>>, vector<8x128xf32>,
    %17 = math.exp %15 : vector<8x128xf32>
    %c0_9 = arith.constant 0 : index
    %c0_10 = arith.constant 0 : index
    %18 = vector.load %arg4[%c0_9, %c0_10] : memref<8x128xf32, #tpu.memory_space<vmem>>, vector<8x128xf32>
    tpu.vector_store %arg4[%c0_9, %c0_10], %17 {strides = array<i32>} : memref<8x128xf32, #tpu.memory_space<vmem>>, vector<8x128xf32>,
    return
  }
  func.func @transform_0(%arg0: i32) -> (i32, i32) {
    %c0_i32 = arith.constant 0 : i32
    %c0_i32_0 = arith.constant 0 : i32
    return %arg0, %c0_i32 : i32, i32
  }
  func.func @transform_1(%arg0: i32) -> (i32, i32) {
    %c0_i32 = arith.constant 0 : i32
    %c0_i32_0 = arith.constant 0 : i32
    %c0_i32_1 = arith.constant 0 : i32
    return %c0_i32, %c0_i32_0 : i32, i32
  }
  func.func @transform_2(%arg0: i32) -> (i32, i32) {
    %c0_i32 = arith.constant 0 : i32
    %c0_i32_0 = arith.constant 0 : i32
    %c0_i32_1 = arith.constant 0 : i32
    return %c0_i32, %c0_i32_0 : i32, i32
  }
  func.func @transform_3(%arg0: i32) -> (i32, i32) {
    %c0_i32 = arith.constant 0 : i32
    %c0_i32_0 = arith.constant 0 : i32
    return %arg0, %c0_i32 : i32, i32
  }
  func.func @transform_4(%arg0: i32) -> (i32, i32) {
    %c0_i32 = arith.constant 0 : i32
    %c0_i32_0 = arith.constant 0 : i32
    return %arg0, %c0_i32 : i32, i32
  }
}

</mosaic_0001>

<bundles_post_ra>
// kernel: tpu_custom_call.1
= control target key start
LH: loop header
LB: loop body
LE: loop exit
PB: predicated region body
PF: predicated region fallthrough
CT: control target
= control target key end

     0   :  { %10 = vsyncpa [#allocation3], 0  ;;  %s401_s0 = inlined_call_operand.hbm [shape: f32[8,32], index: 0, kind: input, shape index: {}]   ;;  %s402_s1 = inlined_call_operand.hbm [shape: f32[32,128], index: 1, kind: input, shape index: {}]   ;;  %s403_s2 = inlined_call_operand.vmem [shape: f32[1,128], index: 2, kind: input, shape index: {}]   ;;  %s404_s3 = inlined_call_operand.hbm [shape: f32[8,128], index: 3, kind: output, shape index: {0}]   ;;  %s405_s4 = inlined_call_operand.hbm [shape: f32[8,128], index: 4, kind: output, shape index: {1}]  }
   0x1   :  { %11 = vsyncpa [#allocation6], 0 }
   0x2   :  { %12 = vsyncpa [#allocation4], 0 }
   0x3   :  { %13 = vsyncpa [#allocation9], 0  ;;  %s309_s15 = smov [#allocation2]   ;;  %s310_s17 = smov [#allocation5]  }
   0x4   :  { %s20_s16 = sshll.u32 %s309_s15, 4  ;;  %s29_s18 = sshll.u32 %s310_s17, 4  ;;  %s21_s16 = int_to_ptr.vmem [resolvable:$true] %s20_s16  ;;  %s343_s18 = int_to_ptr.vmem [resolvable:$true] %s29_s18 }
   0x5   :  { %s213_s21 = scalar_lea.hbm %s401_s0, 128 }
   0x6   :  { %p214_p0 = scmp.ne.s32.totalorder %s401_s0, %s213_s21  ;;  %p217_p1 = scmp.lt.u32.totalorder %s213_s21, %s401_s0 }
   0x8   :  { %p219_p2 = pnand %p217_p1, %p214_p0 }
   0xa   :  { %222 = shalt.err (!%p219_p2)
}
   0xb   :  { %s223_s26 = scalar_lea.vmem %s21_s16, 128  ;;  %p228_p4 = scmp.lt.s32.totalorder %s21_s16, %s21_s16 }
   0xc   :  { %p224_p3 = scmp.ne.s32.totalorder %s21_s16, %s223_s26  ;;  %p229_p5 = scmp.lt.s32.totalorder %s223_s26, %s223_s26 }
   0xe   :  { %p230_p6 = por %p229_p5, %p228_p4 }
  0x10   :  { %p231_p7 = pnand %p230_p6, %p224_p3 }
  0x12   :  { %234 = shalt.err (!%p231_p7)
}
  0x13   :  { %23 = dma.hbm_to_vmem [thread:$0]  %s401_s0, 128, %s21_s16, [#allocation3]  }
  0x14   :  { %s235_s5 = scalar_lea.hbm %s402_s1, 512 }
  0x15   :  { %p236_p8 = scmp.ne.s32.totalorder %s402_s1, %s235_s5  ;;  %p239_p9 = scmp.lt.u32.totalorder %s235_s5, %s402_s1 }
  0x17   :  { %p241_p10 = pnand %p239_p9, %p236_p8 }
  0x19   :  { %244 = shalt.err (!%p241_p10)
}
  0x1a   :  { %s245_s10 = scalar_lea.vmem %s343_s18, 512  ;;  %p250_p12 = scmp.lt.s32.totalorder %s343_s18, %s343_s18 }
  0x1b   :  { %p246_p11 = scmp.ne.s32.totalorder %s343_s18, %s245_s10  ;;  %p251_p13 = scmp.lt.s32.totalorder %s245_s10, %s245_s10 }
  0x1d   :  { %p252_p0 = por %p251_p13, %p250_p12 }
  0x1f   :  { %p253_p1 = pnand %p252_p0, %p246_p11 }
  0x21   :  { %256 = shalt.err (!%p253_p1)
}
  0x22   :  { %s311_s0 = smov 128   ;;  %s312_s11 = smov 8  }
  0x23   :  { %35 = dma.hbm_to_vmem [thread:$0]  %s402_s1, 512, %s343_s18, [#allocation6], %s311_s0, %s311_s0, %s312_s11  }
  0x24   :  { %301 = dma.done.wait [#allocation3], 128  }
  0x25   :  { %302 = vsyncadd [#allocation3], 4294967168 }
  0x26   :  { %303 = dma.done.wait [#allocation6], 512  }
  0x27   :  { %304 = vsyncadd [#allocation6], 4294966784  ;;  %v313_v0 = vmov 0.0|0.0   ;;  %vm314_vm0 = vmmov 0   ;;  %v315_v1 = vmov 0.0   ;;  %v45_v2 = vld [vmem:[#allocation5] sm:$0xff] }
  0x28   :  { %192 = vmatprep.subr.bf16.mxu0 %v313_v0  ;;  %189 = vmatprep.mubr.msk.f32.mxu0 %vm314_vm0, %v315_v1  ;;  %v46_v3 = vld [vmem:[#allocation5 + $0x8] sm:$0xff]  ;;  %v47_v4 = vld [vmem:[#allocation5 + $0x10] sm:$0xff]  ;;  %v48_v6 = vld [vmem:[#allocation5 + $0x18] sm:$0xff]  ;;  %vm56_vm1 = vcmask 261120   ;;  %s316_s15 = smov [#allocation8]  }
  0x29   :  { %v193_v5 = vpack.c.bf16 %v46_v3, %v45_v2  ;;  %v196_v7 = vpack.c.bf16 %v48_v6, %v47_v4  ;;  %v44_v8 = vld [vmem:[#allocation2] sm:$0xff]  ;;  %s160_s16 = sshll.u32 %s316_s15, 4  ;;  %s161_s16 = int_to_ptr.vmem [resolvable:$true] %s160_s16 }
  0x2a   :  { %v174_v9 = vld [vmem:[%s403_s2] ss:$0 sm:$0xff]  ;;  %s257_s2 = scalar_lea.vmem %s161_s16, 128  ;;  %p262_p3 = scmp.lt.s32.totalorder %s161_s16, %s161_s16 }
  0x2b   :  { %194 = vmatpush3.bf16.msra.mxu0 %v193_v5  ;;  %p258_p2 = scmp.ne.s32.totalorder %s161_s16, %s257_s2  ;;  %p263_p4 = scmp.lt.s32.totalorder %s257_s2, %s257_s2 }
  0x2c   :  { %195 = vmatprep.subr.bf16.mxu0 %v313_v0 }
  0x2d   :  { %p264_p5 = por %p263_p4, %p262_p3 }
  0x2f   :  { %197 = vmatpush3.bf16.msra.mxu0 %v196_v7  ;;  %p265_p6 = pnand %p264_p5, %p258_p2 }
  0x32   :  { %190 = vmatmul.mubr.msk.f32.vlgmr.msra.gmra.mrb[0].mxu0 %vm56_vm1, %v44_v8 }
 0x105   :  { %v126_v10 = vpop.f32.mrb[0].mxu0 }
 0x106   :  { %v127_v11 = vadd.f32 %v174_v9, %v126_v10  ;;  %v191_v12 = vpop.f32.mrb[1].mxu0 }
 0x108   :  { %130 = vmax.xlane.f32.xlu0 %v127_v11 }
 0x195   :  { %v131_v13 = vpop.xlane.xlu0 %130 }
 0x196   :  { %v132_v14 = vsub.f32 %v127_v11, %v131_v13 }
 0x198   :  { %v133_v15 = vmul.f32 1.442695, %v132_v14 }
 0x19a   :  { %207 = vpow2.f32 %v133_v15 }
 0x1a4   :  { %v208_v16 = vpop.eup %207 }
 0x1a5   :  { %135 = vadd.xlane.f32.xlu0 %v208_v16 }
 0x232   :  { %v136_v17 = vpop.xlane.xlu0 %135 }
 0x233   :  { %209 = vlog2.f32 %v136_v17 }
 0x23d   :  { %v210_v18 = vpop.eup %209 }
 0x23e   :  { %v138_v19 = vmul.f32 0.6931472, %v210_v18 }
 0x240   :  { %v139_v20 = vsub.f32 %v132_v14, %v138_v19 }
 0x242   :  { %v141_v21 = vmul.f32 1.442695, %v139_v20  ;;  %140 = vst [vmem:[#allocation8] sm:$0xff] %v139_v20 }
 0x243   :  { %268 = shalt.err (!%p265_p6)
}
 0x244   :  { %s269_s19 = scalar_lea.hbm %s405_s4, 128 }
 0x245   :  { %p270_p7 = scmp.ne.s32.totalorder %s405_s4, %s269_s19  ;;  %p273_p8 = scmp.lt.u32.totalorder %s269_s19, %s405_s4 }
 0x247   :  { %p275_p9 = pnand %p273_p8, %p270_p7 }
 0x249   :  { %278 = shalt.err (!%p275_p9)
}
 0x24a   :  { %163 = dma.vmem_to_hbm [thread:$0]  %s161_s16, 128, %s405_s4, [#allocation9]   ;;  %211 = vpow2.f32 %v141_v21 }
 0x24b   :  { %s317_s26 = smov [#allocation7]  }
 0x24c   :  { %s150_s27 = sshll.u32 %s317_s26, 4  ;;  %s151_s27 = int_to_ptr.vmem [resolvable:$true] %s150_s27 }
 0x24d   :  { %s279_s28 = scalar_lea.vmem %s151_s27, 128  ;;  %p284_p11 = scmp.lt.s32.totalorder %s151_s27, %s151_s27 }
 0x24e   :  { %p280_p10 = scmp.ne.s32.totalorder %s151_s27, %s279_s28  ;;  %p285_p12 = scmp.lt.s32.totalorder %s279_s28, %s279_s28 }
 0x250   :  { %p286_p13 = por %p285_p12, %p284_p11 }
 0x252   :  { %p287_p0 = pnand %p286_p13, %p280_p10 }
 0x254   :  { %v212_v22 = vpop.eup %211 }
 0x255   :  { %143 = vst [vmem:[#allocation7] sm:$0xff] %v212_v22 }
 0x256   :  { %290 = shalt.err (!%p287_p0)
}
 0x257   :  { %s291_s5 = scalar_lea.hbm %s404_s3, 128 }
 0x258   :  { %p292_p1 = scmp.ne.s32.totalorder %s404_s3, %s291_s5  ;;  %p295_p2 = scmp.lt.u32.totalorder %s291_s5, %s404_s3 }
 0x25a   :  { %p297_p3 = pnand %p295_p2, %p292_p1 }
 0x25c   :  { %300 = shalt.err (!%p297_p3)
}
 0x25d   :  { %153 = dma.vmem_to_hbm [thread:$0]  %s151_s27, 128, %s404_s3, [#allocation4]  }
 0x25e   :  { %305 = dma.done.wait [#allocation4], 128  }
 0x25f   :  { %306 = vsyncadd [#allocation4], 4294967168 }
 0x260   :  { %307 = dma.done.wait [#allocation9], 128  }
 0x261   :  { %308 = vsyncadd [#allocation9], 4294967168 }
 0x262   :  { %170 = vsyncpa [#allocation3], 1 }
 0x263   :  { %171 = vsyncpa [#allocation6], 1 }
 0x264   :  { %172 = vsyncpa [#allocation4], 1 }
 0x265   :  { %173 = vsyncpa [#allocation9], 1 }

</bundles_post_ra>
